<compile_context>
chip_gen: v7x
topology: tpu7x:2x2x1
jax: 0.10.0
libtpu: 0.0.40
codegen_flags: <defaults>
</compile_context>

<pallas_src>
import functools

import jax
import jax.numpy as jnp
from jax.experimental import pallas as pl
from jax.experimental.pallas import tpu as pltpu

_BIG = 3.0e38      # "+inf" sentinel that stays finite / well-ordered in f32
_NEG = -3.0e38


def _round_up(x, m):
    return (x + m - 1) // m * m


def _pick_label_tile(nc_pad, target):
    """Largest multiple of 128 that is <= target and divides nc_pad."""
    ct = max(128, min(target, nc_pad))
    ct -= ct % 128
    while nc_pad % ct:
        ct -= 128
    return ct


def _knn_kernel(xte_ref, xtrT_ref, xtrsq_ref, woh_ref, out_ref, *,
                k, ntr_pad, num_classes, n_tr_true, label_tile, n_label_tiles):
    xte = xte_ref[...]            # (Tte, D)        f32
    xtrT = xtrT_ref[...]          # (D,   Ntr_p)    f32  (padded cols = 0)
    xtr_sq = xtrsq_ref[...]       # (1,   Ntr_p)    f32  (padded cols = +BIG)

    t_te = xte.shape[0]
    big_f = jnp.float32(_BIG)
    neg_f = jnp.float32(_NEG)
    int_max = jnp.int32(2147483647)

    # ---- selection metric via the BLAS-3 identity (MXU) -------------------
    # ||xtr||^2 - 2*<xte,xtr> is monotone in the true distance along the train
    # axis; the -2 is folded into the small (Tte, D) operand.
    cross = jnp.dot(xte * jnp.float32(-2.0), xtrT,
                    preferred_element_type=jnp.float32)      # (Tte, Ntr_p)
    d_work = xtr_sq + cross                                   # pad cols ~ +BIG

    col_iota = jax.lax.broadcasted_iota(jnp.int32, (t_te, ntr_pad), 1)

    # ---- exact top-k smallest: one column per round, lowest index on ties --
    def topk_body(_, carry):
        d_cur, sel = carry
        row_min = jnp.min(d_cur, axis=-1, keepdims=True)
        is_min = d_cur == row_min
        min_idx = jnp.min(jnp.where(is_min, col_iota, int_max),
                          axis=-1, keepdims=True)
        hit = col_iota == min_idx                    # exactly one col per row
        sel = sel + hit.astype(jnp.float32)
        d_cur = jnp.where(hit, big_f, d_cur)         # never re-selected
        return d_cur, sel

    selected0 = jnp.zeros((t_te, ntr_pad), jnp.float32)
    _, selected = jax.lax.fori_loop(0, k, topk_body, (d_work, selected0),
                                    unroll=(k <= 8))

    # ---- class-width weighted voting + running argmax over label tiles ----
    # woh_ref[t] is the (Ntr_p, label_tile) weight-scaled class one-hot slab
    # for classes [t*label_tile, (t+1)*label_tile)  (precomputed in wrapper).
    tile_iota = jax.lax.broadcasted_iota(jnp.int32, (t_te, label_tile), 1)

    def vote_body(t, carry):
        best_val, best_idx = carry
        votes = jnp.dot(selected, woh_ref[t],
                        preferred_element_type=jnp.float32)   # (Tte, Ct)
        col = tile_iota + t * label_tile
        votes = jnp.where(col < num_classes, votes, neg_f)    # drop pad classes
        tmax = jnp.max(votes, axis=-1, keepdims=True)
        tidx = jnp.min(jnp.where(votes == tmax, col, int_max),
                       axis=-1, keepdims=True)
        take = tmax > best_val     # strict '>' keeps the earliest index on ties
        best_idx = jnp.where(take, tidx, best_idx)
        best_val = jnp.where(take, tmax, best_val)
        return best_val, best_idx

    best_val0 = jnp.full((t_te, 1), neg_f, jnp.float32)
    best_idx0 = jnp.zeros((t_te, 1), jnp.int32)
    best_val, best_idx = jax.lax.fori_loop(
        0, n_label_tiles, vote_body, (best_val0, best_idx0),
        unroll=(n_label_tiles <= 4))

    if num_classes < n_tr_true:
        # The torch vote pool is N_train wide: columns >= num_classes hold 0
        # votes, so if every real class vote is strictly negative the reference
        # argmax lands on column `num_classes` (first all-zero column).
        best_idx = jnp.where(best_val < 0.0, jnp.int32(num_classes), best_idx)

    out_ref[...] = best_idx.astype(jnp.int32)


def knn_predict(x_train, y_train, x_test, w_train, k, *,
                num_classes=None, test_tile=128, max_label_tile=512):
    x_train = jnp.asarray(x_train, jnp.float32)
    x_test = jnp.asarray(x_test, jnp.float32)
    y_train = jnp.asarray(y_train, jnp.int32)
    w_train = jnp.asarray(w_train, jnp.float32)

    n_tr, d = x_train.shape
    n_te = x_test.shape[0]
    k = int(k)
    assert 1 <= k <= n_tr, "require 1 <= k <= N_train"

    # Static class count -> class-width vote pool (biggest win vs. Ntr-width).
    if num_classes is None:
        num_classes = int(jnp.max(y_train)) + 1
    num_classes = int(num_classes)
    assert 1 <= num_classes <= n_tr, "labels must index the N_train-wide pool"

    ntr_pad = _round_up(n_tr, 128)
    nc_pad = _round_up(num_classes, 128)
    label_tile = _pick_label_tile(nc_pad, max_label_tile)
    n_label_tiles = nc_pad // label_tile

    # Test tiling: 8-aligned, and at least 2 grid steps whenever N_test allows
    # (v7x shards "parallel" grid axes across its 2 TensorCores).
    t_te = min(test_tile, max(8, _round_up((n_te + 1) // 2, 8)))
    nte_pad = _round_up(n_te, t_te)

    # ---- one-time, train-only precompute (hoisted out of the kernel) ------
    xtr_t = jnp.zeros((d, ntr_pad), jnp.float32).at[:, :n_tr].set(x_train.T)
    xtr_sq = jnp.full((1, ntr_pad), _BIG, jnp.float32).at[0, :n_tr].set(
        jnp.sum(x_train * x_train, axis=-1))
    # Weight-scaled class one-hot: votes = selected @ w_oh  (f32 kept for exact
    # argmax parity; padded train rows and padded class columns are zero).
    w_oh = jnp.zeros((ntr_pad, nc_pad), jnp.float32).at[:n_tr].set(
        w_train[:, None] * jax.nn.one_hot(y_train, nc_pad, dtype=jnp.float32))
    w_oh_tiles = w_oh.reshape(ntr_pad, n_label_tiles, label_tile)
    w_oh_tiles = jnp.transpose(w_oh_tiles, (1, 0, 2))   # (T, Ntr_p, Ct)

    xte_p = jnp.zeros((nte_pad, d), jnp.float32).at[:n_te].set(x_test)

    # Generation-aware VMEM budget (v7x has 64 MiB/TC -> leave headroom).
    try:
        vmem_cap = int(pltpu.get_tpu_info().vmem_capacity_bytes)
    except Exception:
        vmem_cap = 128 * 1024 * 1024
    vmem_limit = max(16 * 1024 * 1024,
                     min(64 * 1024 * 1024, (vmem_cap * 3) // 4))

    out = pl.pallas_call(
        functools.partial(_knn_kernel, k=k, ntr_pad=ntr_pad,
                          num_classes=num_classes, n_tr_true=n_tr,
                          label_tile=label_tile, n_label_tiles=n_label_tiles),
        grid=(nte_pad // t_te,),
        in_specs=[
            pl.BlockSpec((t_te, d), lambda i: (i, 0)),              # x_test tile
            pl.BlockSpec((d, ntr_pad), lambda i: (0, 0)),           # x_train^T
            pl.BlockSpec((1, ntr_pad), lambda i: (0, 0)),           # ||x_train||^2
            pl.BlockSpec((n_label_tiles, ntr_pad, label_tile),
                         lambda i: (0, 0, 0)),                      # w * onehot(y)
        ],
        out_specs=pl.BlockSpec((t_te, 1), lambda i: (i, 0)),
        out_shape=jax.ShapeDtypeStruct((nte_pad, 1), jnp.int32),
        compiler_params=pltpu.CompilerParams(
            dimension_semantics=("parallel",),
            vmem_limit_bytes=vmem_limit,
        ),
    )(xte_p, xtr_t, xtr_sq, w_oh_tiles)
    return out[:n_te, 0]


def _knn_reference(x_train, y_train, x_test, w_train, k):
    # Pure-JAX reference mirroring the PyTorch module (N_train-wide vote pool).
    diff = x_test[:, None, :] - x_train[None, :, :]
    dists = jnp.sqrt(jnp.maximum(jnp.sum(diff * diff, axis=-1), 0.0))
    idx = jnp.argsort(dists, axis=1)[:, :k]                   # k smallest
    w_sel = w_train[idx]                                      # (Nte, k)
    lab_sel = y_train[idx]                                    # (Nte, k)
    oh = jax.nn.one_hot(lab_sel, x_train.shape[0], dtype=jnp.float32)
    votes = jnp.sum(oh * w_sel[..., None], axis=1)            # (Nte, Ntr)
    return jnp.argmax(votes, axis=1).astype(jnp.int32)


if __name__ == "__main__":
    key = jax.random.PRNGKey(0)
    k_train, k_test, k_lab, k_w = jax.random.split(key, 4)

    N_TRAIN, N_TEST, D, N_CLASSES, K = 32, 8, 16, 5, 3

    x_train = jax.random.normal(k_train, (N_TRAIN, D), dtype=jnp.float32)
    x_test = jax.random.normal(k_test, (N_TEST, D), dtype=jnp.float32)
    y_train = jax.random.randint(k_lab, (N_TRAIN,), 0, N_CLASSES, dtype=jnp.int32)
    w_train = jax.random.uniform(k_w, (N_TRAIN,), dtype=jnp.float32)

    pred = knn_predict(x_train, y_train, x_test, w_train, K)
    pred = jax.block_until_ready(pred)

    ref = jax.block_until_ready(_knn_reference(x_train, y_train, x_test, w_train, K))
    assert pred.shape == (N_TEST,)
    assert bool(jnp.all(pred == ref)), f"mismatch: {pred} vs {ref}"

    print("KERNEL_OK")
</pallas_src>

<mosaic_0001>
module attributes {stable_mosaic.version = 11 : i64} {
  func.func @_knn_kernel(%arg0: i32, %arg1: memref<8x16xf32, #tpu.memory_space<vmem>>, %arg2: memref<16x128xf32, #tpu.memory_space<vmem>>, %arg3: memref<1x128xf32, #tpu.memory_space<vmem>>, %arg4: memref<1x128x128xf32, #tpu.memory_space<vmem>>, %arg5: memref<8x1xi32, #tpu.memory_space<vmem>>) attributes {dimension_semantics = [#tpu.dimension_semantics<parallel>], iteration_bounds = array<i64: 1>, scalar_prefetch = 0 : i64, scratch_operands = 0 : i64, tpu.core_type = #tpu.core_type<tc>, window_params = [{transform_indices = @transform_0, window_bounds = array<i64: 8, 16>}, {pipeline_mode = #tpu.pipeline_mode<synchronous>, transform_indices = @transform_1, window_bounds = array<i64: 16, 128>}, {pipeline_mode = #tpu.pipeline_mode<synchronous>, transform_indices = @transform_2, window_bounds = array<i64: 1, 128>}, {pipeline_mode = #tpu.pipeline_mode<synchronous>, transform_indices = @transform_3, window_bounds = array<i64: 1, 128, 128>}, {transform_indices = @transform_4, window_bounds = array<i64: 8, 1>}]} {
    %c0 = arith.constant 0 : index
    %c0_0 = arith.constant 0 : index
    %0 = vector.load %arg1[%c0, %c0_0] : memref<8x16xf32, #tpu.memory_space<vmem>>, vector<8x16xf32>
    %c0_1 = arith.constant 0 : index
    %c0_2 = arith.constant 0 : index
    %1 = vector.load %arg2[%c0_1, %c0_2] : memref<16x128xf32, #tpu.memory_space<vmem>>, vector<16x128xf32>
    %c0_3 = arith.constant 0 : index
    %c0_4 = arith.constant 0 : index
    %2 = vector.load %arg3[%c0_3, %c0_4] : memref<1x128xf32, #tpu.memory_space<vmem>>, vector<1x128xf32>
    %cst = arith.constant -2.000000e+00 : f32
    %3 = vector.broadcast %cst : f32 to vector<8x16xf32>
    %4 = arith.mulf %0, %3 : vector<8x16xf32>
    %cst_5 = arith.constant dense<0.000000e+00> : vector<8x128xf32>
    %5 = tpu.matmul %4, %1, %cst_5 {dimension_numbers = #tpu.dot_dimension_numbers<[1], [0], [0], [1], [0, 0, 1, 1], [], []>} : vector<8x16xf32>, vector<16x128xf32>, vector<8x128xf32> -> vector<8x128xf32>
    %6 = vector.broadcast %2 : vector<1x128xf32> to vector<8x128xf32>
    %7 = arith.addf %6, %5 : vector<8x128xf32>
    %8 = tpu.iota {dimensions = array<i32: 1>} : vector<8x128xi32>
    %cst_6 = arith.constant 0.000000e+00 : f32
    %9 = vector.broadcast %cst_6 : f32 to vector<8x128xf32>
    %c2147483647_i32 = arith.constant 2147483647 : i32
    %cst_7 = arith.constant 3.000000e+38 : f32
    %c0_i32 = arith.constant 0 : i32
    %cst_8 = arith.constant dense<0x7F800000> : vector<8xf32>
    %10 = vector.multi_reduction <minimumf>, %7, %cst_8 [1] : vector<8x128xf32> to vector<8xf32>
    %11 = vector.shape_cast %10 : vector<8xf32> to vector<8x1xf32>
    %12 = vector.broadcast %11 : vector<8x1xf32> to vector<8x128xf32>
    %13 = arith.cmpf oeq, %7, %12 : vector<8x128xf32>
    %14 = vector.broadcast %c2147483647_i32 : i32 to vector<8x128xi32>
    %15 = arith.select %13, %8, %14 : vector<8x128xi1>, vector<8x128xi32>
    %cst_9 = arith.constant dense<2147483647> : vector<8xi32>
    %16 = vector.multi_reduction <minsi>, %15, %cst_9 [1] : vector<8x128xi32> to vector<8xi32>
    %17 = vector.shape_cast %16 : vector<8xi32> to vector<8x1xi32>
    %18 = vector.broadcast %17 : vector<8x1xi32> to vector<8x128xi32>
    %19 = arith.cmpi eq, %8, %18 : vector<8x128xi32>
    %20 = arith.extui %19 : vector<8x128xi1> to vector<8x128xi32>
    %21 = arith.sitofp %20 : vector<8x128xi32> to vector<8x128xf32>
    %22 = arith.addf %9, %21 : vector<8x128xf32>
    %23 = vector.broadcast %cst_7 : f32 to vector<8x128xf32>
    %24 = arith.select %19, %23, %7 : vector<8x128xi1>, vector<8x128xf32>
    %c1_i32 = arith.constant 1 : i32
    %cst_10 = arith.constant dense<0x7F800000> : vector<8xf32>
    %25 = vector.multi_reduction <minimumf>, %24, %cst_10 [1] : vector<8x128xf32> to vector<8xf32>
    %26 = vector.shape_cast %25 : vector<8xf32> to vector<8x1xf32>
    %27 = vector.broadcast %26 : vector<8x1xf32> to vector<8x128xf32>
    %28 = arith.cmpf oeq, %24, %27 : vector<8x128xf32>
    %29 = vector.broadcast %c2147483647_i32 : i32 to vector<8x128xi32>
    %30 = arith.select %28, %8, %29 : vector<8x128xi1>, vector<8x128xi32>
    %cst_11 = arith.constant dense<2147483647> : vector<8xi32>
    %31 = vector.multi_reduction <minsi>, %30, %cst_11 [1] : vector<8x128xi32> to vector<8xi32>
    %32 = vector.shape_cast %31 : vector<8xi32> to vector<8x1xi32>
    %33 = vector.broadcast %32 : vector<8x1xi32> to vector<8x128xi32>
    %34 = arith.cmpi eq, %8, %33 : vector<8x128xi32>
    %35 = arith.extui %34 : vector<8x128xi1> to vector<8x128xi32>
    %36 = arith.sitofp %35 : vector<8x128xi32> to vector<8x128xf32>
    %37 = arith.addf %22, %36 : vector<8x128xf32>
    %38 = vector.broadcast %cst_7 : f32 to vector<8x128xf32>
    %39 = arith.select %34, %38, %24 : vector<8x128xi1>, vector<8x128xf32>
    %c2_i32 = arith.constant 2 : i32
    %cst_12 = arith.constant dense<0x7F800000> : vector<8xf32>
    %40 = vector.multi_reduction <minimumf>, %39, %cst_12 [1] : vector<8x128xf32> to vector<8xf32>
    %41 = vector.shape_cast %40 : vector<8xf32> to vector<8x1xf32>
    %42 = vector.broadcast %41 : vector<8x1xf32> to vector<8x128xf32>
    %43 = arith.cmpf oeq, %39, %42 : vector<8x128xf32>
    %44 = vector.broadcast %c2147483647_i32 : i32 to vector<8x128xi32>
    %45 = arith.select %43, %8, %44 : vector<8x128xi1>, vector<8x128xi32>
    %cst_13 = arith.constant dense<2147483647> : vector<8xi32>
    %46 = vector.multi_reduction <minsi>, %45, %cst_13 [1] : vector<8x128xi32> to vector<8xi32>
    %47 = vector.shape_cast %46 : vector<8xi32> to vector<8x1xi32>
    %48 = vector.broadcast %47 : vector<8x1xi32> to vector<8x128xi32>
    %49 = arith.cmpi eq, %8, %48 : vector<8x128xi32>
    %50 = arith.extui %49 : vector<8x128xi1> to vector<8x128xi32>
    %51 = arith.sitofp %50 : vector<8x128xi32> to vector<8x128xf32>
    %52 = arith.addf %37, %51 : vector<8x128xf32>
    %53 = vector.broadcast %cst_7 : f32 to vector<8x128xf32>
    %54 = arith.select %49, %53, %39 : vector<8x128xi1>, vector<8x128xf32>
    %55 = tpu.iota {dimensions = array<i32: 1>} : vector<8x128xi32>
    %cst_14 = arith.constant -3.000000e+38 : f32
    %56 = vector.broadcast %cst_14 : f32 to vector<8x1xf32>
    %c0_i32_15 = arith.constant 0 : i32
    %57 = vector.broadcast %c0_i32_15 : i32 to vector<8x1xi32>
    %cst_16 = arith.constant -3.000000e+38 : f32
    %c2147483647_i32_17 = arith.constant 2147483647 : i32
    %c0_i32_18 = arith.constant 0 : i32
    %58 = arith.index_cast %c0_i32_18 : i32 to index
    %c0_19 = arith.constant 0 : index
    %c0_20 = arith.constant 0 : index
    %59 = vector.load %arg4[%58, %c0_19, %c0_20] : memref<1x128x128xf32, #tpu.memory_space<vmem>>, vector<1x128x128xf32>
    %60 = vector.shape_cast %59 : vector<1x128x128xf32> to vector<128x128xf32>
    %cst_21 = arith.constant dense<0.000000e+00> : vector<8x128xf32>
    %61 = tpu.matmul %52, %60, %cst_21 {dimension_numbers = #tpu.dot_dimension_numbers<[1], [0], [0], [1], [0, 0, 1, 1], [], []>} : vector<8x128xf32>, vector<128x128xf32>, vector<8x128xf32> -> vector<8x128xf32>
    %c128_i32 = arith.constant 128 : i32
    %62 = arith.muli %c0_i32_18, %c128_i32 : i32
    %63 = vector.broadcast %62 : i32 to vector<8x128xi32>
    %64 = arith.addi %55, %63 : vector<8x128xi32>
    %c5_i32 = arith.constant 5 : i32
    %65 = vector.broadcast %c5_i32 : i32 to vector<8x128xi32>
    %66 = arith.cmpi slt, %64, %65 : vector<8x128xi32>
    %67 = vector.broadcast %cst_16 : f32 to vector<8x128xf32>
    %68 = arith.select %66, %61, %67 : vector<8x128xi1>, vector<8x128xf32>
    %cst_22 = arith.constant dense<0xFF800000> : vector<8xf32>
    %69 = vector.multi_reduction <maximumf>, %68, %cst_22 [1] : vector<8x128xf32> to vector<8xf32>
    %70 = vector.shape_cast %69 : vector<8xf32> to vector<8x1xf32>
    %71 = vector.broadcast %70 : vector<8x1xf32> to vector<8x128xf32>
    %72 = arith.cmpf oeq, %68, %71 : vector<8x128xf32>
    %73 = vector.broadcast %c2147483647_i32_17 : i32 to vector<8x128xi32>
    %74 = arith.select %72, %64, %73 : vector<8x128xi1>, vector<8x128xi32>
    %cst_23 = arith.constant dense<2147483647> : vector<8xi32>
    %75 = vector.multi_reduction <minsi>, %74, %cst_23 [1] : vector<8x128xi32> to vector<8xi32>
    %76 = vector.shape_cast %75 : vector<8xi32> to vector<8x1xi32>
    %77 = arith.cmpf ogt, %70, %56 : vector<8x1xf32>
    %78 = arith.select %77, %76, %57 : vector<8x1xi1>, vector<8x1xi32>
    %79 = arith.select %77, %70, %56 : vector<8x1xi1>, vector<8x1xf32>
    %c1_i32_24 = arith.constant 1 : i32
    %cst_25 = arith.constant 0.000000e+00 : f32
    %80 = vector.broadcast %cst_25 : f32 to vector<8x1xf32>
    %81 = arith.cmpf olt, %79, %80 : vector<8x1xf32>
    %c5_i32_26 = arith.constant 5 : i32
    %82 = vector.broadcast %c5_i32_26 : i32 to vector<8x1xi32>
    %83 = arith.select %81, %82, %78 : vector<8x1xi1>, vector<8x1xi32>
    %c0_27 = arith.constant 0 : index
    %c0_28 = arith.constant 0 : index
    %84 = vector.load %arg5[%c0_27, %c0_28] : memref<8x1xi32, #tpu.memory_space<vmem>>, vector<8x1xi32>
    tpu.vector_store %arg5[%c0_27, %c0_28], %83 {strides = array<i32>} : memref<8x1xi32, #tpu.memory_space<vmem>>, vector<8x1xi32>,
    return
  }
  func.func @transform_0(%arg0: i32) -> (i32, i32) {
    %c0_i32 = arith.constant 0 : i32
    %c0_i32_0 = arith.constant 0 : i32
    return %arg0, %c0_i32 : i32, i32
  }
  func.func @transform_1(%arg0: i32) -> (i32, i32) {
    %c0_i32 = arith.constant 0 : i32
    %c0_i32_0 = arith.constant 0 : i32
    %c0_i32_1 = arith.constant 0 : i32
    return %c0_i32, %c0_i32_0 : i32, i32
  }
  func.func @transform_2(%arg0: i32) -> (i32, i32) {
    %c0_i32 = arith.constant 0 : i32
    %c0_i32_0 = arith.constant 0 : i32
    %c0_i32_1 = arith.constant 0 : i32
    return %c0_i32, %c0_i32_0 : i32, i32
  }
  func.func @transform_3(%arg0: i32) -> (i32, i32, i32) {
    %c0_i32 = arith.constant 0 : i32
    %c0_i32_0 = arith.constant 0 : i32
    %c0_i32_1 = arith.constant 0 : i32
    %c0_i32_2 = arith.constant 0 : i32
    return %c0_i32, %c0_i32_0, %c0_i32_1 : i32, i32, i32
  }
  func.func @transform_4(%arg0: i32) -> (i32, i32) {
    %c0_i32 = arith.constant 0 : i32
    %c0_i32_0 = arith.constant 0 : i32
    return %arg0, %c0_i32 : i32, i32
  }
}

</mosaic_0001>

<bundles_post_ra>
// kernel: tpu_custom_call.1
= control target key start
LH: loop header
LB: loop body
LE: loop exit
PB: predicated region body
PF: predicated region fallthrough
CT: control target
= control target key end

     0   :  { %9 = vsyncpa [#allocation3], 0  ;;  %s706_s0 = inlined_call_operand.hbm [shape: f32[8,16], index: 0, kind: input, shape index: {}]   ;;  %s707_s1 = inlined_call_operand.hbm [shape: f32[16,128], index: 1, kind: input, shape index: {}]   ;;  %s708_s2 = inlined_call_operand.hbm [shape: f32[1,128], index: 2, kind: input, shape index: {}]   ;;  %s709_s3 = inlined_call_operand.hbm [shape: f32[1,128,128], index: 3, kind: input, shape index: {}]   ;;  %s710_s4 = inlined_call_operand.hbm [shape: s32[8,1], index: 4, kind: output, shape index: {}]  }
   0x1   :  { %10 = vsyncpa [#allocation6], 0 }
   0x2   :  { %11 = vsyncpa [#allocation9], 0 }
   0x3   :  { %12 = vsyncpa [#allocation4], 0  ;;  %s577_s15 = smov [#allocation5]   ;;  %s459_s19 = scalar_lea.hbm %s707_s1, 256 }
   0x4   :  { %s28_s16 = sshll.u32 %s577_s15, 4  ;;  %p460_p0 = scmp.ne.s32.totalorder %s707_s1, %s459_s19  ;;  %s29_s16 = int_to_ptr.vmem [resolvable:$true] %s28_s16 }
   0x5   :  { %p463_p1 = scmp.lt.u32.totalorder %s459_s19, %s707_s1 }
   0x7   :  { %p465_p2 = pnand %p463_p1, %p460_p0 }
   0x9   :  { %468 = shalt.err (!%p465_p2)
}
   0xa   :  { %s469_s24 = scalar_lea.vmem %s29_s16, 256  ;;  %p474_p4 = scmp.lt.s32.totalorder %s29_s16, %s29_s16 }
   0xb   :  { %p470_p3 = scmp.ne.s32.totalorder %s29_s16, %s469_s24  ;;  %p475_p5 = scmp.lt.s32.totalorder %s469_s24, %s469_s24 }
   0xd   :  { %p476_p6 = por %p475_p5, %p474_p4 }
   0xf   :  { %p477_p7 = pnand %p476_p6, %p470_p3 }
  0x11   :  { %480 = shalt.err (!%p477_p7)
}
  0x12   :  { %s578_s25 = smov 128   ;;  %s579_s26 = smov 8  }
  0x13   :  { %34 = dma.hbm_to_vmem [thread:$0]  %s707_s1, 256, %s29_s16, [#allocation6], %s578_s25, %s578_s25, %s579_s26  }
  0x14   :  { %s580_s29 = smov [#allocation2]   ;;  %s581_s5 = smov [#allocation7]  }
  0x15   :  { %s19_s30 = sshll.u32 %s580_s29, 4  ;;  %s41_s6 = sshll.u32 %s581_s5, 4  ;;  %s20_s30 = int_to_ptr.vmem [resolvable:$true] %s19_s30  ;;  %s42_s6 = int_to_ptr.vmem [resolvable:$true] %s41_s6 }
  0x16   :  { %s481_s9 = scalar_lea.hbm %s706_s0, 128 }
  0x17   :  { %p482_p8 = scmp.ne.s32.totalorder %s706_s0, %s481_s9  ;;  %p485_p9 = scmp.lt.u32.totalorder %s481_s9, %s706_s0 }
  0x19   :  { %p487_p10 = pnand %p485_p9, %p482_p8 }
  0x1b   :  { %490 = shalt.err (!%p487_p10)
}
  0x1c   :  { %s491_s1 = scalar_lea.vmem %s20_s30, 128  ;;  %p496_p12 = scmp.lt.s32.totalorder %s20_s30, %s20_s30 }
  0x1d   :  { %p492_p11 = scmp.ne.s32.totalorder %s20_s30, %s491_s1  ;;  %p497_p13 = scmp.lt.s32.totalorder %s491_s1, %s491_s1 }
  0x1f   :  { %p498_p0 = por %p497_p13, %p496_p12 }
  0x21   :  { %p499_p1 = pnand %p498_p0, %p492_p11 }
  0x23   :  { %502 = shalt.err (!%p499_p1)
}
  0x24   :  { %22 = dma.hbm_to_vmem [thread:$0]  %s706_s0, 128, %s20_s30, [#allocation3]  }
  0x25   :  { %s503_s18 = scalar_lea.hbm %s708_s2, 16 }
  0x26   :  { %p504_p2 = scmp.ne.s32.totalorder %s708_s2, %s503_s18  ;;  %p507_p3 = scmp.lt.u32.totalorder %s503_s18, %s708_s2 }
  0x28   :  { %p509_p4 = pnand %p507_p3, %p504_p2 }
  0x2a   :  { %512 = shalt.err (!%p509_p4)
}
  0x2b   :  { %s513_s23 = scalar_lea.vmem %s42_s6, 16  ;;  %s517_s24 = scalar_lea.vmem %s42_s6, 32 }
  0x2c   :  { %p514_p5 = scmp.ne.s32.totalorder %s42_s6, %s513_s23  ;;  %p518_p6 = scmp.lt.s32.totalorder %s42_s6, %s42_s6 }
  0x2d   :  { %p519_p7 = scmp.lt.s32.totalorder %s517_s24, %s513_s23 }
  0x2f   :  { %p520_p8 = por %p519_p7, %p518_p6 }
  0x31   :  { %p521_p9 = pnand %p520_p8, %p514_p5 }
  0x33   :  { %524 = shalt.err (!%p521_p9)
}
  0x34   :  { %44 = dma.hbm_to_vmem [thread:$0]  %s708_s2, 16, %s42_s6, [#allocation6]  }
  0x35   :  { %s582_s28 = smov [#allocation8]   ;;  %s525_s7 = scalar_lea.hbm %s709_s3, 2048 }
  0x36   :  { %s50_s29 = sshll.u32 %s582_s28, 4  ;;  %p526_p10 = scmp.ne.s32.totalorder %s709_s3, %s525_s7  ;;  %s51_s29 = int_to_ptr.vmem [resolvable:$true] %s50_s29 }
  0x37   :  { %p529_p11 = scmp.lt.u32.totalorder %s525_s7, %s709_s3 }
  0x39   :  { %p531_p12 = pnand %p529_p11, %p526_p10 }
  0x3b   :  { %534 = shalt.err (!%p531_p12)
}
  0x3c   :  { %s535_s12 = scalar_lea.vmem %s51_s29, 2048  ;;  %p540_p0 = scmp.lt.s32.totalorder %s51_s29, %s51_s29 }
  0x3d   :  { %p536_p13 = scmp.ne.s32.totalorder %s51_s29, %s535_s12  ;;  %p541_p1 = scmp.lt.s32.totalorder %s535_s12, %s535_s12 }
  0x3f   :  { %p542_p2 = por %p541_p1, %p540_p0 }
  0x41   :  { %p543_p3 = pnand %p542_p2, %p536_p13 }
  0x43   :  { %546 = shalt.err (!%p543_p3)
}
  0x44   :  { %56 = dma.hbm_to_vmem [thread:$0]  %s709_s3, 2048, %s51_s29, [#allocation9], %s578_s25, %s578_s25, %s579_s26  }
  0x45   :  { %569 = dma.done.wait [#allocation3], 128  }
  0x46   :  { %570 = vsyncadd [#allocation3], 4294967168 }
  0x47   :  { %571 = dma.done.wait [#allocation6], 272  }
  0x48   :  { %572 = vsyncadd [#allocation6], 4294967024 }
  0x49   :  { %573 = dma.done.wait [#allocation9], 2048  }
  0x4a   :  { %574 = vsyncadd [#allocation9], 4294965248  ;;  %v583_v0 = vmov 0.0|0.0   ;;  %vm584_vm0 = vmmov 0   ;;  %v585_v1 = vmov 0.0   ;;  %v70_v2 = vld [vmem:[#allocation5] sm:$0xff]  ;;  %v155_v11 = vlaneseq }
  0x4b   :  { %422 = vmatprep.subr.bf16.mxu0 %v583_v0  ;;  %384 = vmatprep.mubr.msk.f32.mxu0 %vm584_vm0, %v585_v1  ;;  %v71_v3 = vld [vmem:[#allocation5 + $0x8] sm:$0xff]  ;;  %v69_v4 = vld [vmem:[#allocation2] sm:$0xff]  ;;  %vm74_vm1 = vcmask 130048   ;;  %v356_v7 = vld [vmem:[#allocation7] ss:$0 sm:$0xff]  ;;  %s586_s3 = smov [#allocation10]  }
  0x4c   :  { %425 = vmatprep.subr.bf16.mxu1 %v583_v0  ;;  %419 = vmatprep.mubr.msk.f32.mxu1 %vm584_vm0, %v585_v1  ;;  %v423_v5 = vpack.c.bf16 %v71_v3, %v70_v2  ;;  %v73_v6 = vmul.f32 -2.0, %v69_v4  ;;  %v670_v12 = vand.u32 127, %v155_v11  ;;  %v225_v48 = vld [vmem:[#allocation8] sm:$0xff]  ;;  %v226_v49 = vld [vmem:[#allocation8 + $0x8] sm:$0xff]  ;;  %v227_v50 = vld [vmem:[#allocation8 + $0x10] sm:$0xff]  ;;  %s344_s25 = sshll.u32 %s586_s3, 4  ;;  %s345_s25 = int_to_ptr.vmem [resolvable:$true] %s344_s25 }
  0x4d   :  { %v426_v51 = vpack.c.bf16 %v226_v49, %v225_v48  ;;  %v228_v52 = vld [vmem:[#allocation8 + $0x18] sm:$0xff]  ;;  %v229_v54 = vld [vmem:[#allocation8 + $0x20] sm:$0xff]  ;;  %v230_v55 = vld [vmem:[#allocation8 + $0x28] sm:$0xff]  ;;  %vm336_vm15 = vcmask 7168   ;;  %s547_s26 = scalar_lea.vmem %s345_s25, 128  ;;  %p552_p5 = scmp.lt.s32.totalorder %s345_s25, %s345_s25 }
  0x4e   :  { %424 = vmatpush3.bf16.msra.mxu0 %v423_v5  ;;  %v429_v53 = vpack.c.bf16 %v228_v52, %v227_v50  ;;  %v432_v56 = vpack.c.bf16 %v230_v55, %v229_v54  ;;  %v231_v57 = vld [vmem:[#allocation8 + $0x30] sm:$0xff]  ;;  %v232_v58 = vld [vmem:[#allocation8 + $0x38] sm:$0xff]  ;;  %v233_v60 = vld [vmem:[#allocation8 + $0x40] sm:$0xff]  ;;  %vm311_vm11 = vcmp.lt.s32.totalorder %v670_v12, 5  ;;  %p548_p4 = scmp.ne.s32.totalorder %s345_s25, %s547_s26  ;;  %p553_p6 = scmp.lt.s32.totalorder %s547_s26, %s547_s26 }
  0x4f   :  { %427 = vmatpush3.bf16.msra.mxu1 %v426_v51  ;;  %v435_v59 = vpack.c.bf16 %v232_v58, %v231_v57  ;;  %v234_v61 = vld [vmem:[#allocation8 + $0x48] sm:$0xff]  ;;  %v235_v63 = vld [vmem:[#allocation8 + $0x50] sm:$0xff]  ;;  %v236_v2 = vld [vmem:[#allocation8 + $0x58] sm:$0xff] }
  0x50   :  { %428 = vmatprep.subr.bf16.mxu1 %v583_v0  ;;  %v438_v62 = vpack.c.bf16 %v234_v61, %v233_v60  ;;  %v441_v3 = vpack.c.bf16 %v236_v2, %v235_v63  ;;  %v239_v11 = vld [vmem:[#allocation8 + $0x70] sm:$0xff]  ;;  %p554_p7 = por %p553_p6, %p552_p5 }
  0x51   :  { %385 = vmatmul.mubr.msk.f32.vlgmr.msra.gmra.mrb[0].mxu0 %vm74_vm1, %v73_v6 }
  0x52   :  { %p555_p8 = pnand %p554_p7, %p548_p4 }
  0x53   :  { %430 = vmatpush3.bf16.msra.mxu1 %v429_v53 }
  0x54   :  { %431 = vmatprep.subr.bf16.mxu1 %v583_v0 }
  0x57   :  { %433 = vmatpush3.bf16.msra.mxu1 %v432_v56 }
  0x58   :  { %434 = vmatprep.subr.bf16.mxu1 %v583_v0 }
  0x5b   :  { %436 = vmatpush3.bf16.msra.mxu1 %v435_v59 }
  0x5c   :  { %437 = vmatprep.subr.bf16.mxu1 %v583_v0 }
  0x5f   :  { %439 = vmatpush3.bf16.msra.mxu1 %v438_v62 }
  0x60   :  { %440 = vmatprep.subr.bf16.mxu1 %v583_v0 }
  0x63   :  { %442 = vmatpush3.bf16.msra.mxu1 %v441_v3 }
  0x64   :  { %443 = vmatprep.subr.bf16.mxu1 %v583_v0 }
 0x124   :  { %v144_v8 = vpop.f32.mrb[0].mxu0 }
 0x125   :  { %v154_v9 = vadd.f32 %v356_v7, %v144_v8  ;;  %v386_v10 = vpop.f32.mrb[1].mxu0  ;;  %v237_v8 = vld [vmem:[#allocation8 + $0x60] sm:$0xff] }
 0x127   :  { %157 = vmin.xlane.f32.xlu0 %v154_v9 }
 0x1b4   :  { %v158_v13 = vpop.xlane.xlu0 %157 }
 0x1b5   :  { %vm159_vm2 = vcmp.eq.f32.partialorder %v154_v9, %v158_v13  ;;  %v240_v13 = vld [vmem:[#allocation8 + $0x78] sm:$0xff] }
 0x1b6   :  { %v160_v14 = vsel %vm159_vm2, %v670_v12, 2147483647 }
 0x1b7   :  { %v162_v15 = vshra.s32 %v160_v14, 16  ;;  %v161_v17 = vand.u32 65535, %v160_v14  ;;  %v447_v14 = vpack.c.bf16 %v240_v13, %v239_v11 }
 0x1b9   :  { %v164_v16 = vcvt.s32.f32 %v162_v15  ;;  %v163_v19 = vcvt.s32.f32 %v161_v17 }
 0x1bb   :  { %165 = vmin.xlane.f32.xlu0 %v164_v16 }
 0x248   :  { %v166_v18 = vpop.xlane.xlu0 %165 }
 0x249   :  { %vm167_vm3 = vcmp.eq.f32.partialorder %v164_v16, %v166_v18  ;;  %v172_v21 = vcvt.f32.s32 %v166_v18 }
 0x24a   :  { %v168_v20 = vsel %vm167_vm3, %v163_v19, inf }
 0x24b   :  { %169 = vmin.xlane.f32.xlu1 %v168_v20  ;;  %v173_v23 = vshll.u32 %v172_v21, 16 }
 0x2d8   :  { %v170_v22 = vpop.xlane.xlu1 %169 }
 0x2d9   :  { %v171_v24 = vcvt.f32.s32 %v170_v22 }
 0x2db   :  { %v174_v25 = vadd.s32 %v173_v23, %v171_v24 }
 0x2dd   :  { %vm175_vm4 = vcmp.eq.s32.totalorder %v670_v12, %v174_v25 }
 0x2de   :  { %v179_v26 = vsel %vm175_vm4, 3e+38, %v154_v9  ;;  %v357_v40 = vsel %vm175_vm4, 1.0, %v585_v1  ;;  %v238_v9 = vld [vmem:[#allocation8 + $0x68] sm:$0xff] }
 0x2df   :  { %180 = vmin.xlane.f32.xlu1 %v179_v26  ;;  %v444_v10 = vpack.c.bf16 %v238_v9, %v237_v8 }
 0x2e1   :  { %445 = vmatpush3.bf16.msra.mxu1 %v444_v10 }
 0x2e2   :  { %446 = vmatprep.subr.bf16.mxu1 %v583_v0 }
 0x2e5   :  { %448 = vmatpush3.bf16.msra.mxu1 %v447_v14 }
 0x36c   :  { %v181_v27 = vpop.xlane.xlu1 %180 }
 0x36d   :  { %vm182_vm5 = vcmp.eq.f32.partialorder %v179_v26, %v181_v27 }
 0x36e   :  { %v183_v28 = vsel %vm182_vm5, %v670_v12, 2147483647 }
 0x36f   :  { %v185_v29 = vshra.s32 %v183_v28, 16  ;;  %v184_v31 = vand.u32 65535, %v183_v28 }
 0x371   :  { %v187_v30 = vcvt.s32.f32 %v185_v29  ;;  %v186_v33 = vcvt.s32.f32 %v184_v31 }
 0x373   :  { %188 = vmin.xlane.f32.xlu0 %v187_v30 }
 0x400   :  { %v189_v32 = vpop.xlane.xlu0 %188 }
 0x401   :  { %vm190_vm6 = vcmp.eq.f32.partialorder %v187_v30, %v189_v32  ;;  %v195_v35 = vcvt.f32.s32 %v189_v32 }
 0x402   :  { %v191_v34 = vsel %vm190_vm6, %v186_v33, inf }
 0x403   :  { %192 = vmin.xlane.f32.xlu1 %v191_v34  ;;  %v196_v37 = vshll.u32 %v195_v35, 16 }
 0x490   :  { %v193_v36 = vpop.xlane.xlu1 %192 }
 0x491   :  { %v194_v38 = vcvt.f32.s32 %v193_v36 }
 0x493   :  { %v197_v39 = vadd.s32 %v196_v37, %v194_v38 }
 0x495   :  { %vm198_vm7 = vcmp.eq.s32.totalorder %v670_v12, %v197_v39 }
 0x496   :  { %v202_v41 = vsel %vm198_vm7, 3e+38, %v179_v26  ;;  %v358_v42 = vsel %vm198_vm7, 1.0, %v585_v1 }
 0x497   :  { %203 = vmin.xlane.f32.xlu0 %v202_v41  ;;  %v201_v43 = vadd.f32 %v358_v42, %v357_v40 }
 0x524   :  { %v204_v44 = vpop.xlane.xlu0 %203 }
 0x525   :  { %vm205_vm8 = vcmp.eq.f32.partialorder %v202_v41, %v204_v44 }
 0x526   :  { %v206_v45 = vsel %vm205_vm8, %v670_v12, 2147483647 }
 0x527   :  { %v208_v46 = vshra.s32 %v206_v45, 16  ;;  %v207_v4 = vand.u32 65535, %v206_v45 }
 0x529   :  { %v210_v47 = vcvt.s32.f32 %v208_v46  ;;  %v209_v6 = vcvt.s32.f32 %v207_v4 }
 0x52b   :  { %211 = vmin.xlane.f32.xlu1 %v210_v47 }
 0x5b8   :  { %v212_v5 = vpop.xlane.xlu1 %211 }
 0x5b9   :  { %vm213_vm9 = vcmp.eq.f32.partialorder %v210_v47, %v212_v5  ;;  %v218_v15 = vcvt.f32.s32 %v212_v5 }
 0x5ba   :  { %v214_v7 = vsel %vm213_vm9, %v209_v6, inf }
 0x5bb   :  { %215 = vmin.xlane.f32.xlu0 %v214_v7  ;;  %v219_v17 = vshll.u32 %v218_v15, 16 }
 0x648   :  { %v216_v16 = vpop.xlane.xlu0 %215 }
 0x649   :  { %v217_v18 = vcvt.f32.s32 %v216_v16 }
 0x64b   :  { %v220_v19 = vadd.s32 %v219_v17, %v217_v18 }
 0x64d   :  { %vm221_vm10 = vcmp.eq.s32.totalorder %v670_v12, %v220_v19 }
 0x64e   :  { %v359_v20 = vsel %vm221_vm10, 1.0, %v585_v1 }
 0x64f   :  { %v224_v21 = vadd.f32 %v359_v20, %v201_v43 }
 0x651   :  { %420 = vmatmul.mubr.f32.vlgmr.msra.gmra.mrb[0].mxu1 %v224_v21 }
 0x724   :  { %v307_v22 = vpop.f32.mrb[0].mxu1 }
 0x725   :  { %v421_v23 = vpop.f32.mrb[1].mxu1  ;;  %v312_v0 = vsel %vm311_vm11, %v307_v22, -3e+38 }
 0x726   :  { %313 = vmax.xlane.f32.xlu1 %v312_v0 }
 0x7b3   :  { %v314_v24 = vpop.xlane.xlu1 %313 }
 0x7b4   :  { %vm315_vm12 = vcmp.eq.f32.partialorder %v312_v0, %v314_v24  ;;  %vm331_vm14 = vcmp.gt.f32.partialorder %v314_v24, -3e+38 }
 0x7b5   :  { %v316_v25 = vsel %vm315_vm12, %v670_v12, 2147483647  ;;  %v333_v35 = vsel %vm331_vm14, %v314_v24, -3e+38 }
 0x7b6   :  { %v318_v26 = vshra.s32 %v316_v25, 16  ;;  %v317_v28 = vand.u32 65535, %v316_v25  ;;  %vm334_vm0 = vcmp.lt.f32.partialorder %v333_v35, 0.0 }
 0x7b8   :  { %v320_v27 = vcvt.s32.f32 %v318_v26  ;;  %v319_v30 = vcvt.s32.f32 %v317_v28 }
 0x7ba   :  { %321 = vmin.xlane.f32.xlu0 %v320_v27 }
 0x847   :  { %v322_v29 = vpop.xlane.xlu0 %321 }
 0x848   :  { %vm323_vm13 = vcmp.eq.f32.partialorder %v320_v27, %v322_v29  ;;  %v328_v31 = vcvt.f32.s32 %v322_v29 }
 0x849   :  { %v324_v1 = vsel %vm323_vm13, %v319_v30, inf }
 0x84a   :  { %325 = vmin.xlane.f32.xlu1 %v324_v1  ;;  %v329_v33 = vshll.u32 %v328_v31, 16 }
 0x8d7   :  { %v326_v32 = vpop.xlane.xlu1 %325 }
 0x8d8   :  { %v327_v34 = vcvt.f32.s32 %v326_v32 }
 0x8da   :  { %v330_v36 = vadd.s32 %v329_v33, %v327_v34 }
 0x8dc   :  { %v332_v12 = vsel %vm331_vm14, %v330_v36, 0 }
 0x8dd   :  { %v335_v37 = vsel %vm334_vm0, 5, %v332_v12 }
 0x8de   :  { %337 = vst.msk [vmem:[#allocation10] sm:$0xff] %vm336_vm15, %v335_v37 }
 0x8df   :  { %558 = shalt.err (!%p555_p8)
}
 0x8e0   :  { %s559_s14 = scalar_lea.hbm %s710_s4, 128 }
 0x8e1   :  { %p560_p9 = scmp.ne.s32.totalorder %s710_s4, %s559_s14  ;;  %p563_p10 = scmp.lt.u32.totalorder %s559_s14, %s710_s4 }
 0x8e3   :  { %p565_p11 = pnand %p563_p10, %p560_p9 }
 0x8e5   :  { %568 = shalt.err (!%p565_p11)
}
 0x8e6   :  { %347 = dma.vmem_to_hbm [thread:$0]  %s345_s25, 128, %s710_s4, [#allocation4]  }
 0x8e7   :  { %575 = dma.done.wait [#allocation4], 128  }
 0x8e8   :  { %576 = vsyncadd [#allocation4], 4294967168 }
 0x8e9   :  { %351 = vsyncpa [#allocation3], 1 }
 0x8ea   :  { %352 = vsyncpa [#allocation6], 1 }
 0x8eb   :  { %353 = vsyncpa [#allocation9], 1 }
 0x8ec   :  { %354 = vsyncpa [#allocation4], 1 }

</bundles_post_ra>
